<compile_context>
chip_gen: v5e
topology: v5e:2x2
jax: 0.10.0
libtpu: 0.0.40
codegen_flags: <defaults>
</compile_context>

<pallas_src>
import functools

import jax
import jax.numpy as jnp
from jax import lax
from jax.experimental import pallas as pl
from jax.experimental.pallas import tpu as pltpu


# ---------------------------------------------------------------------------
# Per-generation sizing (VMEM limit + tile caps)
# ---------------------------------------------------------------------------
@functools.lru_cache(maxsize=1)
def _hw_caps():
    try:
        vmem_cap = int(pltpu.get_tpu_info().vmem_capacity_bytes)
    except Exception:
        vmem_cap = 64 * 1024 * 1024          # conservative (v7x-sized) fallback
    vmem_limit = int(vmem_cap * 0.75)        # ~96 MiB on v5e/v6e, ~48 MiB on v7x
    big = vmem_cap >= 100 * 1024 * 1024
    rt_cap = 1024 if big else 512            # projection row-tile cap
    tt_cap = 64 if big else 32               # recurrence time-tile cap
    return vmem_limit, rt_cap, tt_cap


def _round_up(n, m):
    return ((n + m - 1) // m) * m


def _largest_divisor_leq(n, cap):
    cap = max(1, min(n, cap))
    for d in range(cap, 0, -1):
        if n % d == 0:
            return d
    return 1


def _pick_time_tile(T, B, H, vmem_limit, requested=None, tt_cap=64):
    if requested is not None and 0 < requested <= T and T % requested == 0:
        return requested
    # VMEM per unit of Tt: double-buffered bf16 xp blocks (2 dirs, 4H wide) plus
    # double-buffered bf16 output blocks (2 dirs, H wide).
    per_t = 2 * 2 * (B * 4 * H + B * H) * 2
    budget = max(vmem_limit // 3, per_t)     # leave room for weights / scratch
    cap = min(tt_cap, max(1, budget // per_t))
    return _largest_divisor_leq(T, cap)


# ---------------------------------------------------------------------------
# Kernel 1: hoisted input projection (whole sequence, both directions at once)
# ---------------------------------------------------------------------------
def _proj_first_kernel(x_ref, wf_ref, wb_ref, bf_ref, bb_ref, of_ref, ob_ref):
    x = x_ref[...]
    gf = jnp.dot(x, wf_ref[...], preferred_element_type=jnp.float32) + bf_ref[...]
    gb = jnp.dot(x, wb_ref[...], preferred_element_type=jnp.float32) + bb_ref[...]
    of_ref[...] = gf.astype(of_ref.dtype)
    ob_ref[...] = gb.astype(ob_ref.dtype)


def _pad_rows(x2d, rows_padded):
    R = x2d.shape[0]
    if rows_padded == R:
        return x2d
    return jnp.pad(x2d, ((0, rows_padded - R), (0, 0)))


def input_projection_first(x2d, w_f, w_b, b_f, b_b, *, out_dtype=jnp.bfloat16):
    """x2d: (R, D) -> two (R, 4H) gate pre-activations (fwd / bwd). Bias folded in."""
    R, D = x2d.shape
    G = w_f.shape[1]
    vmem_limit, rt_cap, _ = _hw_caps()
    Rt = min(rt_cap, _round_up(R, 16))       # 16-sublane aligned bf16 row tiles
    Rp = _round_up(R, Rt)                    # pad rows instead of divisor hunting
    xp = _pad_rows(x2d, Rp)
    row = pl.BlockSpec((Rt, D), lambda i: (i, 0))
    full = lambda shape: pl.BlockSpec(shape, lambda i: (0, 0))
    out_row = pl.BlockSpec((Rt, G), lambda i: (i, 0))
    of, ob = pl.pallas_call(
        _proj_first_kernel,
        out_shape=(jax.ShapeDtypeStruct((Rp, G), out_dtype),
                   jax.ShapeDtypeStruct((Rp, G), out_dtype)),
        grid_spec=pltpu.PrefetchScalarGridSpec(
            num_scalar_prefetch=0, grid=(Rp // Rt,),
            in_specs=[row, full((D, G)), full((D, G)), full((1, G)), full((1, G))],
            out_specs=(out_row, out_row)),
        compiler_params=pltpu.CompilerParams(
            dimension_semantics=("parallel",), vmem_limit_bytes=vmem_limit),
    )(xp, w_f, w_b, b_f, b_b)
    return of[:R], ob[:R]


def _proj_pair_kernel(xf_ref, xb_ref, wff_ref, wbf_ref, wfb_ref, wbb_ref,
                      bf_ref, bb_ref, of_ref, ob_ref):
    xf = xf_ref[...]
    xb = xb_ref[...]
    gf = (jnp.dot(xf, wff_ref[...], preferred_element_type=jnp.float32)
          + jnp.dot(xb, wbf_ref[...], preferred_element_type=jnp.float32)
          + bf_ref[...])
    gb = (jnp.dot(xf, wfb_ref[...], preferred_element_type=jnp.float32)
          + jnp.dot(xb, wbb_ref[...], preferred_element_type=jnp.float32)
          + bb_ref[...])
    of_ref[...] = gf.astype(of_ref.dtype)
    ob_ref[...] = gb.astype(ob_ref.dtype)


def input_projection_pair(xf2d, xb2d, wff, wbf, wfb, wbb, b_f, b_b, *,
                          out_dtype=jnp.bfloat16):
    """Projection for layers >= 1.  Consumes the previous layer's fwd/bwd halves
    separately (split W_ih) so the (T,B,2H) concat is never materialized in HBM."""
    R, Hin = xf2d.shape
    G = wff.shape[1]
    vmem_limit, rt_cap, _ = _hw_caps()
    Rt = min(rt_cap, _round_up(R, 16))
    Rp = _round_up(R, Rt)
    xf = _pad_rows(xf2d, Rp)
    xb = _pad_rows(xb2d, Rp)
    row = pl.BlockSpec((Rt, Hin), lambda i: (i, 0))
    full = lambda shape: pl.BlockSpec(shape, lambda i: (0, 0))
    out_row = pl.BlockSpec((Rt, G), lambda i: (i, 0))
    of, ob = pl.pallas_call(
        _proj_pair_kernel,
        out_shape=(jax.ShapeDtypeStruct((Rp, G), out_dtype),
                   jax.ShapeDtypeStruct((Rp, G), out_dtype)),
        grid_spec=pltpu.PrefetchScalarGridSpec(
            num_scalar_prefetch=0, grid=(Rp // Rt,),
            in_specs=[row, row,
                      full((Hin, G)), full((Hin, G)), full((Hin, G)), full((Hin, G)),
                      full((1, G)), full((1, G))],
            out_specs=(out_row, out_row)),
        compiler_params=pltpu.CompilerParams(
            dimension_semantics=("parallel",), vmem_limit_bytes=vmem_limit),
    )(xf, xb, wff, wbf, wfb, wbb, b_f, b_b)
    return of[:R], ob[:R]


# ---------------------------------------------------------------------------
# Kernel 2: fused bidirectional LSTM recurrence (time-blocked grid)
# ---------------------------------------------------------------------------
def _lstm_gates(gates, c_prev):
    """gates: (B, 4H) f32 in PyTorch order (i, f, g, o); c_prev: (B, H) f32."""
    H = c_prev.shape[-1]
    i_g = jax.nn.sigmoid(gates[:, 0 * H:1 * H])
    f_g = jax.nn.sigmoid(gates[:, 1 * H:2 * H])
    g_g = jnp.tanh(gates[:, 2 * H:3 * H])
    o_g = jax.nn.sigmoid(gates[:, 3 * H:4 * H])
    c_new = f_g * c_prev + i_g * g_g
    h_new = o_g * jnp.tanh(c_new)
    return h_new, c_new


def _bidir_step(xp_f_t, xp_b_t, h_f, c_f, h_b, c_b, whh_cat):
    """One timestep of both directions with a SINGLE stacked MXU matmul.
    h/c are carried in f32 vregs; only the MXU LHS is cast to bf16.
    whh_cat: (H, 8H) = [W_hh_fwd | W_hh_bwd] along the output axis."""
    B = h_f.shape[0]
    G = xp_f_t.shape[-1]                                              # 4H
    h_stack = jnp.concatenate([h_f, h_b], axis=0).astype(jnp.bfloat16)  # (2B, H)
    hg = jnp.dot(h_stack, whh_cat, preferred_element_type=jnp.float32)  # (2B, 8H)
    gf = xp_f_t.astype(jnp.float32) + hg[:B, :G]
    gb = xp_b_t.astype(jnp.float32) + hg[B:, G:]
    hf_new, cf_new = _lstm_gates(gf, c_f)
    hb_new, cb_new = _lstm_gates(gb, c_b)
    return hf_new, cf_new, hb_new, cb_new


def _bilstm_seq_kernel(xp_f_ref, xp_b_ref, whh_ref, out_f_ref, out_b_ref,
                       h_f_s, c_f_s, h_b_s, c_b_s):
    @pl.when(pl.program_id(0) == 0)
    def _():
        h_f_s[...] = jnp.zeros_like(h_f_s)
        c_f_s[...] = jnp.zeros_like(c_f_s)
        h_b_s[...] = jnp.zeros_like(h_b_s)
        c_b_s[...] = jnp.zeros_like(c_b_s)

    Tt = xp_f_ref.shape[0]
    whh = whh_ref[...]                      # (H, 8H) bf16, hoisted out of the loop

    def step(tl, carry):
        h_f, c_f, h_b, c_b = carry
        # backward direction: blocks arrive in reversed order via the index_map
        # and we walk them backwards locally, so global time T-1-step lines up.
        tb = Tt - 1 - tl
        hf_new, cf_new, hb_new, cb_new = _bidir_step(
            xp_f_ref[tl], xp_b_ref[tb], h_f, c_f, h_b, c_b, whh)
        out_f_ref[tl] = hf_new.astype(out_f_ref.dtype)
        out_b_ref[tb] = hb_new.astype(out_b_ref.dtype)
        return hf_new, cf_new, hb_new, cb_new

    # State lives in the loop carry (vregs); scratch is touched only at the
    # block boundaries so it can persist across grid steps.
    carry0 = (h_f_s[...], c_f_s[...], h_b_s[...], c_b_s[...])
    unroll = Tt if Tt <= 16 else 4
    h_f, c_f, h_b, c_b = lax.fori_loop(0, Tt, step, carry0, unroll=unroll)
    h_f_s[...] = h_f
    c_f_s[...] = c_f
    h_b_s[...] = h_b
    c_b_s[...] = c_b


def bilstm_layer(xp_f, xp_b, whh_cat, *, time_tile=None):
    """One bidirectional LSTM layer given precomputed input projections.
    Returns (out_f, out_b), each (T, B, H) in natural time order."""
    T, B, G = xp_f.shape
    H = G // 4
    vmem_limit, _, tt_cap = _hw_caps()
    Tt = _pick_time_tile(T, B, H, vmem_limit, time_tile, tt_cap)
    nblk = T // Tt
    fwd_in = pl.BlockSpec((Tt, B, G), lambda i: (i, 0, 0))
    bwd_in = pl.BlockSpec((Tt, B, G), lambda i: (nblk - 1 - i, 0, 0))
    w_spec = pl.BlockSpec((H, 2 * G), lambda i: (0, 0))
    fwd_out = pl.BlockSpec((Tt, B, H), lambda i: (i, 0, 0))
    bwd_out = pl.BlockSpec((Tt, B, H), lambda i: (nblk - 1 - i, 0, 0))
    return pl.pallas_call(
        _bilstm_seq_kernel,
        out_shape=(jax.ShapeDtypeStruct((T, B, H), jnp.bfloat16),
                   jax.ShapeDtypeStruct((T, B, H), jnp.bfloat16)),
        grid_spec=pltpu.PrefetchScalarGridSpec(
            num_scalar_prefetch=0, grid=(nblk,),
            in_specs=[fwd_in, bwd_in, w_spec],
            out_specs=(fwd_out, bwd_out),
            scratch_shapes=[pltpu.VMEM((B, H), jnp.float32)] * 4),
        compiler_params=pltpu.CompilerParams(
            dimension_semantics=("arbitrary",), vmem_limit_bytes=vmem_limit),
    )(xp_f, xp_b, whh_cat)


# ---------------------------------------------------------------------------
# Kernel 3: last layer, fused with running-max pooling + Linear(2H->1) + sigmoid
# ---------------------------------------------------------------------------
def _bilstm_pool_head_kernel(xp_f_ref, xp_b_ref, whh_ref, whf_ref, whb_ref, bh_ref,
                             prob_ref, pool_ref,
                             h_f_s, c_f_s, h_b_s, c_b_s, mx_f_s, mx_b_s):
    @pl.when(pl.program_id(0) == 0)
    def _():
        h_f_s[...] = jnp.zeros_like(h_f_s)
        c_f_s[...] = jnp.zeros_like(c_f_s)
        h_b_s[...] = jnp.zeros_like(h_b_s)
        c_b_s[...] = jnp.zeros_like(c_b_s)
        mx_f_s[...] = jnp.full_like(mx_f_s, -jnp.inf)
        mx_b_s[...] = jnp.full_like(mx_b_s, -jnp.inf)

    Tt = xp_f_ref.shape[0]
    H = h_f_s.shape[1]
    whh = whh_ref[...]

    def step(tl, carry):
        h_f, c_f, h_b, c_b, mx_f, mx_b = carry
        tb = Tt - 1 - tl
        hf_new, cf_new, hb_new, cb_new = _bidir_step(
            xp_f_ref[tl], xp_b_ref[tb], h_f, c_f, h_b, c_b, whh)
        # Max over time is order-invariant, so the reversed backward traversal
        # needs no realignment.
        mx_f = jnp.maximum(mx_f, hf_new)
        mx_b = jnp.maximum(mx_b, hb_new)
        return hf_new, cf_new, hb_new, cb_new, mx_f, mx_b

    carry0 = (h_f_s[...], c_f_s[...], h_b_s[...], c_b_s[...],
              mx_f_s[...], mx_b_s[...])
    unroll = Tt if Tt <= 16 else 4
    h_f, c_f, h_b, c_b, mx_f, mx_b = lax.fori_loop(0, Tt, step, carry0,
                                                   unroll=unroll)
    h_f_s[...] = h_f
    c_f_s[...] = c_f
    h_b_s[...] = h_b
    c_b_s[...] = c_b
    mx_f_s[...] = mx_f
    mx_b_s[...] = mx_b

    @pl.when(pl.program_id(0) == pl.num_programs(0) - 1)
    def _():
        # TODO(synk): nn.Dropout(p=0.5) on the pooled features is identity in eval
        # mode; training-mode stochastic dropout is not implemented here.
        # Head as two half-width VPU multiply + lane reductions (no (B,2H) concat,
        # no N=1 MXU matmul).
        logits = (jnp.sum(mx_f * whf_ref[...], axis=-1, keepdims=True)
                  + jnp.sum(mx_b * whb_ref[...], axis=-1, keepdims=True)
                  + bh_ref[...])
        prob_ref[...] = jax.nn.sigmoid(logits)
        pool_ref[:, :H] = mx_f
        pool_ref[:, H:] = mx_b


def bilstm_pool_head(xp_f, xp_b, whh_cat, w_head_f, w_head_b, b_head, *,
                     time_tile=None):
    T, B, G = xp_f.shape
    H = G // 4
    vmem_limit, _, tt_cap = _hw_caps()
    Tt = _pick_time_tile(T, B, H, vmem_limit, time_tile, tt_cap)
    nblk = T // Tt
    fwd_in = pl.BlockSpec((Tt, B, G), lambda i: (i, 0, 0))
    bwd_in = pl.BlockSpec((Tt, B, G), lambda i: (nblk - 1 - i, 0, 0))
    w_spec = pl.BlockSpec((H, 2 * G), lambda i: (0, 0))
    head_w = pl.BlockSpec((1, H), lambda i: (0, 0))
    head_b = pl.BlockSpec((1, 1), lambda i: (0, 0))
    prob_spec = pl.BlockSpec((B, 1), lambda i: (0, 0))
    pool_spec = pl.BlockSpec((B, 2 * H), lambda i: (0, 0))
    return pl.pallas_call(
        _bilstm_pool_head_kernel,
        out_shape=(jax.ShapeDtypeStruct((B, 1), jnp.float32),
                   jax.ShapeDtypeStruct((B, 2 * H), jnp.float32)),
        grid_spec=pltpu.PrefetchScalarGridSpec(
            num_scalar_prefetch=0, grid=(nblk,),
            in_specs=[fwd_in, bwd_in, w_spec, head_w, head_w, head_b],
            out_specs=(prob_spec, pool_spec),
            scratch_shapes=[pltpu.VMEM((B, H), jnp.float32)] * 6),
        compiler_params=pltpu.CompilerParams(
            dimension_semantics=("arbitrary",), vmem_limit_bytes=vmem_limit),
    )(xp_f, xp_b, whh_cat, w_head_f, w_head_b, b_head)


# ---------------------------------------------------------------------------
# Parameter init (PyTorch-style uniform(-1/sqrt(H), 1/sqrt(H)), pre-arranged)
# ---------------------------------------------------------------------------
def init_params(key, embedding_size, hidden_size, num_layers, dtype=jnp.bfloat16):
    H = hidden_size
    scale = 1.0 / float(H) ** 0.5
    layers = []
    for layer in range(num_layers):
        in_size = embedding_size if layer == 0 else 2 * H
        key, *ks = jax.random.split(key, 9)
        u = lambda k, s: jax.random.uniform(k, s, jnp.float32, -scale, scale)
        wih_f = u(ks[0], (in_size, 4 * H)); whh_f = u(ks[1], (H, 4 * H))
        b_f = (u(ks[2], (4 * H,)) + u(ks[3], (4 * H,))).reshape(1, -1)   # b_ih + b_hh
        wih_b = u(ks[4], (in_size, 4 * H)); whh_b = u(ks[5], (H, 4 * H))
        b_b = (u(ks[6], (4 * H,)) + u(ks[7], (4 * H,))).reshape(1, -1)
        # Fused recurrent weight: one (H, 8H) matmul drives both directions.
        whh_cat = jnp.concatenate([whh_f, whh_b], axis=1).astype(dtype)
        p = {"whh_cat": whh_cat, "b_f": b_f, "b_b": b_b}
        if layer == 0:
            p["wih_f"] = wih_f.astype(dtype)
            p["wih_b"] = wih_b.astype(dtype)
        else:
            # Split W_ih into the rows that multiply the fwd / bwd halves of the
            # previous layer's output, so no (T,B,2H) concat is ever materialized.
            p["wff"] = wih_f[:H].astype(dtype)
            p["wbf"] = wih_f[H:].astype(dtype)
            p["wfb"] = wih_b[:H].astype(dtype)
            p["wbb"] = wih_b[H:].astype(dtype)
        layers.append(p)
    key, kw, kb = jax.random.split(key, 3)
    lin_scale = 1.0 / float(2 * H) ** 0.5
    w_row = jax.random.uniform(kw, (1, 2 * H), jnp.float32, -lin_scale, lin_scale)
    b = jax.random.uniform(kb, (1, 1), jnp.float32, -lin_scale, lin_scale)
    # Head weight split into fwd / bwd halves (half-width dot products in-kernel).
    return layers, (w_row[:, :H], w_row[:, H:], b)


# ---------------------------------------------------------------------------
# Forward pass (matches LSTMPoolingClassifier.forward, eval mode)
# ---------------------------------------------------------------------------
def lstm_pooling_classifier_forward(x, lstm_params, head_params, *, time_tile=None):
    """x: (B, T, E), batch-first like nn.LSTM(batch_first=True)."""
    B, T, E = x.shape
    num_layers = len(lstm_params)
    # Single layout pass to time-major bf16; everything stays time-major afterwards.
    x_t = jnp.transpose(x, (1, 0, 2)).astype(jnp.bfloat16)          # (T, B, E)

    cur_f = cur_b = None
    prob = pool = None
    for l, p in enumerate(lstm_params):
        if l == 0:
            xp_f2, xp_b2 = input_projection_first(
                x_t.reshape(T * B, E), p["wih_f"], p["wih_b"], p["b_f"], p["b_b"])
        else:
            # TODO(synk): inter-layer LSTM dropout (training mode) omitted; eval semantics.
            H_prev = cur_f.shape[-1]
            xp_f2, xp_b2 = input_projection_pair(
                cur_f.reshape(T * B, H_prev), cur_b.reshape(T * B, H_prev),
                p["wff"], p["wbf"], p["wfb"], p["wbb"], p["b_f"], p["b_b"])
        G = xp_f2.shape[-1]
        xp_f = xp_f2.reshape(T, B, G)
        xp_b = xp_b2.reshape(T, B, G)
        if l < num_layers - 1:
            cur_f, cur_b = bilstm_layer(xp_f, xp_b, p["whh_cat"], time_tile=time_tile)
        else:
            prob, pool = bilstm_pool_head(xp_f, xp_b, p["whh_cat"],
                                          head_params[0], head_params[1],
                                          head_params[2], time_tile=time_tile)
    return jnp.squeeze(prob, axis=-1), pool                          # (B,), (B, 2H)


if __name__ == "__main__":
    B, T, E, H, L = 2, 8, 32, 32, 2
    key = jax.random.PRNGKey(0)
    kx, kp = jax.random.split(key)
    x = jax.random.normal(kx, (B, T, E), dtype=jnp.float32)
    lstm_params, head_params = init_params(kp, E, H, L)

    # time_tile=4 -> 2 time blocks, exercising the reversed-block pipelining.
    out, pool = lstm_pooling_classifier_forward(x, lstm_params, head_params,
                                                time_tile=4)
    jax.block_until_ready((out, pool))
    assert out.shape == (B,) and pool.shape == (B, 2 * H)
    assert bool(jnp.all(jnp.isfinite(out))) and bool(jnp.all(jnp.isfinite(pool)))
    print("KERNEL_OK")
</pallas_src>

<mosaic_0001>
module attributes {stable_mosaic.version = 11 : i64} {
  func.func @_proj_first_kernel(%arg0: i32, %arg1: memref<16x32xbf16, #tpu.memory_space<vmem>>, %arg2: memref<32x128xbf16, #tpu.memory_space<vmem>>, %arg3: memref<32x128xbf16, #tpu.memory_space<vmem>>, %arg4: memref<1x128xf32, #tpu.memory_space<vmem>>, %arg5: memref<1x128xf32, #tpu.memory_space<vmem>>, %arg6: memref<16x128xbf16, #tpu.memory_space<vmem>>, %arg7: memref<16x128xbf16, #tpu.memory_space<vmem>>) attributes {dimension_semantics = [#tpu.dimension_semantics<parallel>], iteration_bounds = array<i64: 1>, scalar_prefetch = 0 : i64, scratch_operands = 0 : i64, tpu.core_type = #tpu.core_type<tc>, window_params = [{transform_indices = @transform_0, window_bounds = array<i64: 16, 32>}, {pipeline_mode = #tpu.pipeline_mode<synchronous>, transform_indices = @transform_1, window_bounds = array<i64: 32, 128>}, {pipeline_mode = #tpu.pipeline_mode<synchronous>, transform_indices = @transform_2, window_bounds = array<i64: 32, 128>}, {pipeline_mode = #tpu.pipeline_mode<synchronous>, transform_indices = @transform_3, window_bounds = array<i64: 1, 128>}, {pipeline_mode = #tpu.pipeline_mode<synchronous>, transform_indices = @transform_4, window_bounds = array<i64: 1, 128>}, {transform_indices = @transform_5, window_bounds = array<i64: 16, 128>}, {transform_indices = @transform_6, window_bounds = array<i64: 16, 128>}]} {
    %c0 = arith.constant 0 : index
    %c0_0 = arith.constant 0 : index
    %0 = vector.load %arg1[%c0, %c0_0] : memref<16x32xbf16, #tpu.memory_space<vmem>>, vector<16x32xbf16>
    %c0_1 = arith.constant 0 : index
    %c0_2 = arith.constant 0 : index
    %1 = vector.load %arg2[%c0_1, %c0_2] : memref<32x128xbf16, #tpu.memory_space<vmem>>, vector<32x128xbf16>
    %cst = arith.constant dense<0.000000e+00> : vector<16x128xf32>
    %2 = tpu.matmul %0, %1, %cst {dimension_numbers = #tpu.dot_dimension_numbers<[1], [0], [0], [1], [0, 0, 1, 1], [], []>} : vector<16x32xbf16>, vector<32x128xbf16>, vector<16x128xf32> -> vector<16x128xf32>
    %c0_3 = arith.constant 0 : index
    %c0_4 = arith.constant 0 : index
    %3 = vector.load %arg4[%c0_3, %c0_4] : memref<1x128xf32, #tpu.memory_space<vmem>>, vector<1x128xf32>
    %4 = vector.broadcast %3 : vector<1x128xf32> to vector<16x128xf32>
    %5 = arith.addf %2, %4 : vector<16x128xf32>
    %c0_5 = arith.constant 0 : index
    %c0_6 = arith.constant 0 : index
    %6 = vector.load %arg3[%c0_5, %c0_6] : memref<32x128xbf16, #tpu.memory_space<vmem>>, vector<32x128xbf16>
    %cst_7 = arith.constant dense<0.000000e+00> : vector<16x128xf32>
    %7 = tpu.matmul %0, %6, %cst_7 {dimension_numbers = #tpu.dot_dimension_numbers<[1], [0], [0], [1], [0, 0, 1, 1], [], []>} : vector<16x32xbf16>, vector<32x128xbf16>, vector<16x128xf32> -> vector<16x128xf32>
    %c0_8 = arith.constant 0 : index
    %c0_9 = arith.constant 0 : index
    %8 = vector.load %arg5[%c0_8, %c0_9] : memref<1x128xf32, #tpu.memory_space<vmem>>, vector<1x128xf32>
    %9 = vector.broadcast %8 : vector<1x128xf32> to vector<16x128xf32>
    %10 = arith.addf %7, %9 : vector<16x128xf32>
    %11 = arith.truncf %5 : vector<16x128xf32> to vector<16x128xbf16>
    %c0_10 = arith.constant 0 : index
    %c0_11 = arith.constant 0 : index
    %12 = vector.load %arg6[%c0_10, %c0_11] : memref<16x128xbf16, #tpu.memory_space<vmem>>, vector<16x128xbf16>
    tpu.vector_store %arg6[%c0_10, %c0_11], %11 {strides = array<i32>} : memref<16x128xbf16, #tpu.memory_space<vmem>>, vector<16x128xbf16>,
    %13 = arith.truncf %10 : vector<16x128xf32> to vector<16x128xbf16>
    %c0_12 = arith.constant 0 : index
    %c0_13 = arith.constant 0 : index
    %14 = vector.load %arg7[%c0_12, %c0_13] : memref<16x128xbf16, #tpu.memory_space<vmem>>, vector<16x128xbf16>
    tpu.vector_store %arg7[%c0_12, %c0_13], %13 {strides = array<i32>} : memref<16x128xbf16, #tpu.memory_space<vmem>>, vector<16x128xbf16>,
    return
  }
  func.func @transform_0(%arg0: i32) -> (i32, i32) {
    %c0_i32 = arith.constant 0 : i32
    %c0_i32_0 = arith.constant 0 : i32
    return %arg0, %c0_i32 : i32, i32
  }
  func.func @transform_1(%arg0: i32) -> (i32, i32) {
    %c0_i32 = arith.constant 0 : i32
    %c0_i32_0 = arith.constant 0 : i32
    %c0_i32_1 = arith.constant 0 : i32
    return %c0_i32, %c0_i32_0 : i32, i32
  }
  func.func @transform_2(%arg0: i32) -> (i32, i32) {
    %c0_i32 = arith.constant 0 : i32
    %c0_i32_0 = arith.constant 0 : i32
    %c0_i32_1 = arith.constant 0 : i32
    return %c0_i32, %c0_i32_0 : i32, i32
  }
  func.func @transform_3(%arg0: i32) -> (i32, i32) {
    %c0_i32 = arith.constant 0 : i32
    %c0_i32_0 = arith.constant 0 : i32
    %c0_i32_1 = arith.constant 0 : i32
    return %c0_i32, %c0_i32_0 : i32, i32
  }
  func.func @transform_4(%arg0: i32) -> (i32, i32) {
    %c0_i32 = arith.constant 0 : i32
    %c0_i32_0 = arith.constant 0 : i32
    %c0_i32_1 = arith.constant 0 : i32
    return %c0_i32, %c0_i32_0 : i32, i32
  }
  func.func @transform_5(%arg0: i32) -> (i32, i32) {
    %c0_i32 = arith.constant 0 : i32
    %c0_i32_0 = arith.constant 0 : i32
    return %arg0, %c0_i32 : i32, i32
  }
  func.func @transform_6(%arg0: i32) -> (i32, i32) {
    %c0_i32 = arith.constant 0 : i32
    %c0_i32_0 = arith.constant 0 : i32
    return %arg0, %c0_i32 : i32, i32
  }
}

</mosaic_0001>

<bundles_post_ra>
// kernel: tpu_custom_call.1
= control target key start
LH: loop header
LB: loop body
LE: loop exit
PB: predicated region body
PF: predicated region fallthrough
CT: control target
= control target key end

     0   :  { %12 = vsyncpa [#allocation3], 0  ;;  %s449_s0 = inlined_call_operand.hbm [shape: bf16[16,32], index: 0, kind: input, shape index: {}]   ;;  %s450_s1 = inlined_call_operand.hbm [shape: bf16[32,128], index: 1, kind: input, shape index: {}]   ;;  %s451_s2 = inlined_call_operand.hbm [shape: bf16[32,128], index: 2, kind: input, shape index: {}]   ;;  %s452_s3 = inlined_call_operand.vmem [shape: f32[1,128], index: 3, kind: input, shape index: {}]   ;;  %s453_s4 = inlined_call_operand.vmem [shape: f32[1,128], index: 4, kind: input, shape index: {}]   ;;  %s454_s5 = inlined_call_operand.hbm [shape: bf16[16,128], index: 5, kind: output, shape index: {0}]   ;;  %s455_s6 = inlined_call_operand.hbm [shape: bf16[16,128], index: 6, kind: output, shape index: {1}]  }
   0x1   :  { %13 = vsyncpa [#allocation6], 0 }
   0x2   :  { %14 = vsyncpa [#allocation4], 0 }
   0x3   :  { %15 = vsyncpa [#allocation10], 0  ;;  %s33_s23 = sshll.u32 %s450_s1, 4  ;;  %s371_s24 = smov [#allocation5]   ;;  %s34_s23 = int_to_ptr.hbm [resolvable:$true] %s33_s23 }
   0x4   :  { %s35_s25 = sshll.u32 %s371_s24, 4  ;;  %s20_s28 = sshll.u32 %s449_s0, 4  ;;  %s36_s25 = int_to_ptr.vmem [resolvable:$true] %s35_s25  ;;  %s21_s28 = int_to_ptr.hbm [resolvable:$true] %s20_s28 }
   0x5   :  { %s372_s29 = smov 64   ;;  %s373_s30 = smov 4  }
   0x6   :  { %41 = dma.hbm_to_vmem [thread:$0]  %s34_s23, 256, %s36_s25, [#allocation6], %s372_s29, %s372_s29, %s373_s30  }
   0x7   :  { %s374_s7 = smov [#allocation2]   ;;  %s46_s1 = sshll.u32 %s451_s2, 4  ;;  %s47_s1 = int_to_ptr.hbm [resolvable:$true] %s46_s1 }
   0x8   :  { %s22_s8 = sshll.u32 %s374_s7, 4  ;;  %s375_s0 = smov [#allocation7]   ;;  %s23_s8 = int_to_ptr.vmem [resolvable:$true] %s22_s8 }
   0x9   :  { %28 = dma.hbm_to_vmem [thread:$0]  %s21_s28, 128, %s23_s8, [#allocation3], %s372_s29, %s372_s29, %s373_s30  }
   0xa   :  { %s48_s11 = sshll.u32 %s375_s0, 4  ;;  %s49_s11 = int_to_ptr.vmem [resolvable:$true] %s48_s11 }
   0xb   :  { %54 = dma.hbm_to_vmem [thread:$0]  %s47_s1, 256, %s49_s11, [#allocation6], %s372_s29, %s372_s29, %s373_s30  }
   0xc   :  { %363 = dma.done.wait [#allocation3], 128  }
   0xd   :  { %364 = vsyncadd [#allocation3], 4294967168 }
   0xe   :  { %365 = dma.done.wait [#allocation6], 512  }
   0xf   :  { %366 = vsyncadd [#allocation6], 4294966784  ;;  %v221_v0 = vld [vmem:[#allocation5 + $0x8] sm:$0xff]  ;;  %v223_v1 = vld [vmem:[#allocation7 + $0x8] sm:$0xff]  ;;  %vm99_vm0 = vcmask 261120   ;;  %s376_s15 = smov [#allocation8]  }
  0x10   :  { %109 = vmatpush.bf16.msra.mxu0 %v221_v0  ;;  %143 = vmatpush.bf16.msra.mxu1 %v223_v1  ;;  %v220_v2 = vld [vmem:[#allocation5] sm:$0xff]  ;;  %v222_v3 = vld [vmem:[#allocation7] sm:$0xff]  ;;  %v219_v4 = vld [vmem:[#allocation2] sm:$0xff]  ;;  %s163_s16 = sshll.u32 %s376_s15, 4  ;;  %s165_s19 = sshll.u32 %s454_s5, 4  ;;  %s164_s16 = int_to_ptr.vmem [resolvable:$true] %s163_s16  ;;  %s166_s19 = int_to_ptr.hbm [resolvable:$true] %s165_s19 }
  0x11   :  { %v241_v7 = vld [vmem:[%s452_s3] ss:$0 sm:$0xff]  ;;  %s377_s20 = smov [#allocation9]   ;;  %s178_s23 = sshll.u32 %s455_s6, 4  ;;  %s179_s23 = int_to_ptr.hbm [resolvable:$true] %s178_s23 }
  0x12   :  { %v242_v8 = vld [vmem:[%s453_s4] ss:$0 sm:$0xff]  ;;  %s176_s21 = sshll.u32 %s377_s20, 4  ;;  %s177_s21 = int_to_ptr.vmem [resolvable:$true] %s176_s21 }
  0x14   :  { %110 = vmatpush.bf16.msra.mxu0 %v220_v2  ;;  %144 = vmatpush.bf16.msra.mxu1 %v222_v3 }
  0x17   :  { %209 = vmatmul.msk.bf16.vlgmr.msra.gmra.mxu0 %vm99_vm0, %v219_v4  ;;  %218 = vmatmul.msk.bf16.vlgmr.msra.gmra.mxu1 %vm99_vm0, %v219_v4 }
  0x94   :  { %v112_v5 = vpop.f32.mrf.mxu0  ;;  %v146_v6 = vpop.f32.mrf.mxu1 }
  0x95   :  { %v113_v11 = vadd.f32 %v241_v7, %v112_v5  ;;  %v147_v12 = vadd.f32 %v242_v8, %v146_v6 }
  0x9c   :  { %v114_v9 = vpop.f32.mrf.mxu0  ;;  %v148_v10 = vpop.f32.mrf.mxu1 }
  0x9d   :  { %v115_v13 = vadd.f32 %v241_v7, %v114_v9  ;;  %v149_v14 = vadd.f32 %v242_v8, %v148_v10 }
  0x9f   :  { %v227_v15 = vpack.c.bf16 %v115_v13, %v113_v11  ;;  %v232_v16 = vpack.c.bf16 %v149_v14, %v147_v12 }
  0xa1   :  { %228 = vst [vmem:[#allocation8] sm:$0xff] %v227_v15  }
  0xa2   :  { %233 = vst [vmem:[#allocation9] sm:$0xff] %v232_v16   ;;  %171 = dma.vmem_to_hbm [thread:$0]  %s164_s16, 128, %s166_s19, [#allocation4], %s372_s29, %s372_s29, %s373_s30  }
  0xa3   :  { %184 = dma.vmem_to_hbm [thread:$0]  %s177_s21, 128, %s179_s23, [#allocation10], %s372_s29, %s372_s29, %s373_s30  }
  0xa4   :  { %367 = dma.done.wait [#allocation4], 128  }
  0xa5   :  { %368 = vsyncadd [#allocation4], 4294967168 }
  0xa6   :  { %369 = dma.done.wait [#allocation10], 128  }
  0xa7   :  { %370 = vsyncadd [#allocation10], 4294967168 }
  0xa8   :  { %193 = vsyncpa [#allocation3], 1 }
  0xa9   :  { %194 = vsyncpa [#allocation6], 1 }
  0xaa   :  { %195 = vsyncpa [#allocation4], 1 }
  0xab   :  { %196 = vsyncpa [#allocation10], 1 }

</bundles_post_ra>
